<compile_context>
chip_gen: v6e
topology: v6e:2x2x1
jax: 0.10.0
libtpu: 0.0.40
codegen_flags: <defaults>
</compile_context>

<pallas_src>
import math

import jax
import jax.numpy as jnp
from jax.experimental import pallas as pl
from jax.experimental.pallas import tpu as pltpu

LN_EPS = 1e-5


def _layer_norm(x, eps=LN_EPS):
    mu = jnp.mean(x, axis=-1, keepdims=True)
    xc = x - mu
    var = jnp.mean(xc * xc, axis=-1, keepdims=True)
    return xc * jax.lax.rsqrt(var + eps)


# --------------------------------- kernel -----------------------------------
def _time_attention_eval_kernel(x_ref, w_ref, b_ref, g_ref, beta_ref, out_ref):
    """res = (LN_p(x^T @ Wp + bp) * gamma + beta)^T + x   (eval-mode forward)."""
    f32 = jnp.float32
    x = x_ref[...].astype(f32)                    # [Bb, C, S]
    Bb, C, S = x.shape

    # Projection-branch input: `out` of the module == x exactly in eval mode
    # (softmax rows sum to 1), so feed x^T straight into the Linear.
    xt = jnp.transpose(x, (0, 2, 1))              # [Bb, S, C]
    t16 = xt.reshape(Bb * S, C).astype(jnp.bfloat16)   # M = Bb*S rows for the MXU

    y = jnp.dot(t16, w_ref[...], preferred_element_type=f32) + b_ref[...]
    y = _layer_norm(y) * g_ref[...] + beta_ref[...]     # affine LayerNorm (f32)
    y = y.reshape(Bb, S, C)

    # rearrange 'b o s c -> b o c s' and add the residual; single store to HBM.
    out_ref[...] = (jnp.transpose(y, (0, 2, 1)) + x).astype(out_ref.dtype)


# ------------------------------ pallas_call glue -----------------------------
def _pick_batch_block(batch, c, s, vmem_budget_bytes=20 * 1024 * 1024):
    """Largest divisor of `batch` that fits a VMEM budget.

    ~bytes live per batch element in a block: double-buffered x/out f32 blocks
    (4 copies) + xt / y / y^T f32 intermediates (~3 copies) + bf16 temp.
    Prefer >=2 grid steps when the batch allows it so the "parallel" axis can
    shard across both v7x TensorCores; on 1-TC chips the extra step costs only
    ~0.35 us, negligible for this HBM-bound kernel.
    """
    per_elem_bytes = 32 * c * s
    cap = max(1, vmem_budget_bytes // per_elem_bytes)
    if batch >= 2:
        cap = min(cap, batch // 2)
    best = 1
    for cand in range(1, batch + 1):
        if batch % cand == 0 and cand <= cap:
            best = cand
    return best


def time_attention_forward(params, x, *, sequence_num=128, inter=6):
    """Eval-mode time_attention forward.  x: [B, time_size, S] -> same shape.

    `sequence_num` / `inter` only parameterize the attention branch, which is
    an exact identity in eval mode, so they do not affect the result here.
    """
    del sequence_num, inter      # attention branch is identity in eval mode
    B, C, S = x.shape
    p = params["projection"]
    w16 = p["w_bf16"] if "w_bf16" in p else p["w"].astype(jnp.bfloat16)

    b_blk = _pick_batch_block(B, C, S)
    grid = (B // b_blk,)

    itemsize = jnp.dtype(x.dtype).itemsize
    flops = 2 * B * S * C * C + 10 * B * S * C          # MXU matmul + LN/residual VPU work
    bytes_accessed = 2 * B * C * S * itemsize + C * C * 2 + 3 * C * 4
    cost = pl.CostEstimate(flops=flops, transcendentals=B * S,
                           bytes_accessed=bytes_accessed)

    return pl.pallas_call(
        _time_attention_eval_kernel,
        out_shape=jax.ShapeDtypeStruct((B, C, S), x.dtype),
        grid=grid,
        in_specs=[
            pl.BlockSpec((b_blk, C, S), lambda i: (i, 0, 0)),   # x  (batch-blocked)
            pl.BlockSpec((C, C), lambda i: (0, 0)),             # Wp (bf16, pre-cast)
            pl.BlockSpec((1, C), lambda i: (0, 0)),             # bp
            pl.BlockSpec((1, C), lambda i: (0, 0)),             # gamma_p
            pl.BlockSpec((1, C), lambda i: (0, 0)),             # beta_p
        ],
        out_specs=pl.BlockSpec((b_blk, C, S), lambda i: (i, 0, 0)),
        compiler_params=pltpu.CompilerParams(
            dimension_semantics=("parallel",),
            vmem_limit_bytes=32 * 1024 * 1024),
        cost_estimate=cost,
    )(x, w16, p["b"], p["gamma"], p["beta"])


# -------------------------------- parameters --------------------------------
def init_params(key, time_size):
    """Matches the module init: xavier_normal_ Linear weights, zero biases,
    default LayerNorm affine (gamma=1, beta=0).  Weights stored [in, out];
    a bf16 copy is pre-cast once for the kernel (review item)."""
    keys = jax.random.split(key, 3)
    std = math.sqrt(2.0 / (time_size + time_size))

    def branch(k):
        w = std * jax.random.normal(k, (time_size, time_size), jnp.float32)
        return {
            "w": w,
            "w_bf16": w.astype(jnp.bfloat16),
            "b": jnp.zeros((1, time_size), jnp.float32),
            "gamma": jnp.ones((1, time_size), jnp.float32),
            "beta": jnp.zeros((1, time_size), jnp.float32),
        }

    return {"query": branch(keys[0]), "key": branch(keys[1]),
            "projection": branch(keys[2])}


# ---------------------------- pure-JAX reference -----------------------------
def _reference_forward(params, x, *, sequence_num, inter):
    """Full (un-shortcut) eval-mode forward in f32 — validates the identity."""
    x = x.astype(jnp.float32)
    B, C, S = x.shape

    def branch(t, p):
        y = t @ p["w"] + p["b"]
        return _layer_norm(y) * p["gamma"] + p["beta"]

    xt = jnp.swapaxes(x, 1, 2)                        # [B, S, C]
    temp = _layer_norm(xt)                            # fresh LN (gamma=1, beta=0)
    q = branch(temp, params["query"])
    k = branch(temp, params["key"])
    s_pool = (S - inter) // inter + 1                 # AvgPool drops partial window
    qv = q[:, :s_pool * inter, :].reshape(B, s_pool, inter, C).mean(axis=2)
    kv = k[:, :s_pool * inter, :].reshape(B, s_pool, inter, C).mean(axis=2)
    att = jnp.einsum('bpc,bpm->bcm', qv, kv) / math.sqrt(sequence_num // inter)
    probs = jax.nn.softmax(att, axis=-1)
    out = x * jnp.sum(probs, axis=-1)[:, :, None]     # [B, C, S]
    y = branch(jnp.swapaxes(out, 1, 2), params["projection"])
    return jnp.swapaxes(y, 1, 2) + x


if __name__ == "__main__":
    # Small config consistent with the module: the Linear/LayerNorm feature dim
    # is time_size (channel axis of x); the pooled axis has sequence_num samples.
    TIME_SIZE, SEQ_NUM, INTER = 32, 16, 4             # module defaults: 440, 128, 6
    BATCH = 4

    key = jax.random.PRNGKey(0)
    pkey, xkey = jax.random.split(key)
    params = init_params(pkey, TIME_SIZE)
    x = jax.random.normal(xkey, (BATCH, TIME_SIZE, SEQ_NUM), jnp.float32)

    out = time_attention_forward(params, x, sequence_num=SEQ_NUM, inter=INTER)
    out = jax.block_until_ready(out)

    assert out.shape == (BATCH, TIME_SIZE, SEQ_NUM)
    assert bool(jnp.all(jnp.isfinite(out)))

    ref = _reference_forward(params, x, sequence_num=SEQ_NUM, inter=INTER)
    max_err = float(jnp.max(jnp.abs(out - ref)))
    assert max_err < 1e-1, f"kernel/reference mismatch: max_err={max_err}"

    print("KERNEL_OK")
</pallas_src>

<mosaic_0001>
module attributes {stable_mosaic.version = 11 : i64} {
  func.func @_time_attention_eval_kernel(%arg0: i32, %arg1: memref<2x32x16xf32, #tpu.memory_space<vmem>>, %arg2: memref<32x32xbf16, #tpu.memory_space<vmem>>, %arg3: memref<1x32xf32, #tpu.memory_space<vmem>>, %arg4: memref<1x32xf32, #tpu.memory_space<vmem>>, %arg5: memref<1x32xf32, #tpu.memory_space<vmem>>, %arg6: memref<2x32x16xf32, #tpu.memory_space<vmem>>) attributes {dimension_semantics = [#tpu.dimension_semantics<parallel>], iteration_bounds = array<i64: 2>, scalar_prefetch = 0 : i64, scratch_operands = 0 : i64, tpu.core_type = #tpu.core_type<tc>, window_params = [{transform_indices = @transform_0, window_bounds = array<i64: 2, 32, 16>}, {pipeline_mode = #tpu.pipeline_mode<synchronous>, transform_indices = @transform_1, window_bounds = array<i64: 32, 32>}, {pipeline_mode = #tpu.pipeline_mode<synchronous>, transform_indices = @transform_2, window_bounds = array<i64: 1, 32>}, {pipeline_mode = #tpu.pipeline_mode<synchronous>, transform_indices = @transform_3, window_bounds = array<i64: 1, 32>}, {pipeline_mode = #tpu.pipeline_mode<synchronous>, transform_indices = @transform_4, window_bounds = array<i64: 1, 32>}, {transform_indices = @transform_5, window_bounds = array<i64: 2, 32, 16>}]} {
    %c0 = arith.constant 0 : index
    %c0_0 = arith.constant 0 : index
    %c0_1 = arith.constant 0 : index
    %0 = vector.load %arg1[%c0, %c0_0, %c0_1] : memref<2x32x16xf32, #tpu.memory_space<vmem>>, vector<2x32x16xf32>
    %1 = tpu.transpose %0, [0, 2, 1] : vector<2x32x16xf32> -> vector<2x16x32xf32>
    %2 = vector.shape_cast %1 : vector<2x16x32xf32> to vector<32x32xf32>
    %3 = arith.truncf %2 : vector<32x32xf32> to vector<32x32xbf16>
    %c0_2 = arith.constant 0 : index
    %c0_3 = arith.constant 0 : index
    %4 = vector.load %arg2[%c0_2, %c0_3] : memref<32x32xbf16, #tpu.memory_space<vmem>>, vector<32x32xbf16>
    %cst = arith.constant dense<0.000000e+00> : vector<32x32xf32>
    %5 = tpu.matmul %3, %4, %cst {dimension_numbers = #tpu.dot_dimension_numbers<[1], [0], [0], [1], [0, 0, 1, 1], [], []>} : vector<32x32xbf16>, vector<32x32xbf16>, vector<32x32xf32> -> vector<32x32xf32>
    %c0_4 = arith.constant 0 : index
    %c0_5 = arith.constant 0 : index
    %6 = vector.load %arg3[%c0_4, %c0_5] : memref<1x32xf32, #tpu.memory_space<vmem>>, vector<1x32xf32>
    %7 = vector.broadcast %6 : vector<1x32xf32> to vector<32x32xf32>
    %8 = arith.addf %5, %7 : vector<32x32xf32>
    %cst_6 = arith.constant dense<0.000000e+00> : vector<32xf32>
    %9 = vector.multi_reduction <add>, %8, %cst_6 [1] : vector<32x32xf32> to vector<32xf32>
    %10 = vector.shape_cast %9 : vector<32xf32> to vector<32x1xf32>
    %cst_7 = arith.constant 3.200000e+01 : f32
    %11 = vector.broadcast %cst_7 : f32 to vector<32x1xf32>
    %12 = arith.divf %10, %11 : vector<32x1xf32>
    %13 = vector.broadcast %12 : vector<32x1xf32> to vector<32x32xf32>
    %14 = arith.subf %8, %13 : vector<32x32xf32>
    %15 = arith.mulf %14, %14 : vector<32x32xf32>
    %cst_8 = arith.constant dense<0.000000e+00> : vector<32xf32>
    %16 = vector.multi_reduction <add>, %15, %cst_8 [1] : vector<32x32xf32> to vector<32xf32>
    %17 = vector.shape_cast %16 : vector<32xf32> to vector<32x1xf32>
    %cst_9 = arith.constant 3.200000e+01 : f32
    %18 = vector.broadcast %cst_9 : f32 to vector<32x1xf32>
    %19 = arith.divf %17, %18 : vector<32x1xf32>
    %cst_10 = arith.constant 9.99999974E-6 : f32
    %20 = vector.broadcast %cst_10 : f32 to vector<32x1xf32>
    %21 = arith.addf %19, %20 : vector<32x1xf32>
    %22 = math.rsqrt %21 : vector<32x1xf32>
    %23 = vector.broadcast %22 : vector<32x1xf32> to vector<32x32xf32>
    %24 = arith.mulf %14, %23 : vector<32x32xf32>
    %c0_11 = arith.constant 0 : index
    %c0_12 = arith.constant 0 : index
    %25 = vector.load %arg4[%c0_11, %c0_12] : memref<1x32xf32, #tpu.memory_space<vmem>>, vector<1x32xf32>
    %26 = vector.broadcast %25 : vector<1x32xf32> to vector<32x32xf32>
    %27 = arith.mulf %24, %26 : vector<32x32xf32>
    %c0_13 = arith.constant 0 : index
    %c0_14 = arith.constant 0 : index
    %28 = vector.load %arg5[%c0_13, %c0_14] : memref<1x32xf32, #tpu.memory_space<vmem>>, vector<1x32xf32>
    %29 = vector.broadcast %28 : vector<1x32xf32> to vector<32x32xf32>
    %30 = arith.addf %27, %29 : vector<32x32xf32>
    %31 = vector.shape_cast %30 : vector<32x32xf32> to vector<2x16x32xf32>
    %32 = tpu.transpose %31, [0, 2, 1] : vector<2x16x32xf32> -> vector<2x32x16xf32>
    %33 = arith.addf %32, %0 : vector<2x32x16xf32>
    %c0_15 = arith.constant 0 : index
    %c0_16 = arith.constant 0 : index
    %c0_17 = arith.constant 0 : index
    %34 = vector.load %arg6[%c0_15, %c0_16, %c0_17] : memref<2x32x16xf32, #tpu.memory_space<vmem>>, vector<2x32x16xf32>
    tpu.vector_store %arg6[%c0_15, %c0_16, %c0_17], %33 {strides = array<i32>} : memref<2x32x16xf32, #tpu.memory_space<vmem>>, vector<2x32x16xf32>,
    return
  }
  func.func @transform_0(%arg0: i32) -> (i32, i32, i32) {
    %c0_i32 = arith.constant 0 : i32
    %c0_i32_0 = arith.constant 0 : i32
    %c0_i32_1 = arith.constant 0 : i32
    return %arg0, %c0_i32, %c0_i32_0 : i32, i32, i32
  }
  func.func @transform_1(%arg0: i32) -> (i32, i32) {
    %c0_i32 = arith.constant 0 : i32
    %c0_i32_0 = arith.constant 0 : i32
    %c0_i32_1 = arith.constant 0 : i32
    return %c0_i32, %c0_i32_0 : i32, i32
  }
  func.func @transform_2(%arg0: i32) -> (i32, i32) {
    %c0_i32 = arith.constant 0 : i32
    %c0_i32_0 = arith.constant 0 : i32
    %c0_i32_1 = arith.constant 0 : i32
    return %c0_i32, %c0_i32_0 : i32, i32
  }
  func.func @transform_3(%arg0: i32) -> (i32, i32) {
    %c0_i32 = arith.constant 0 : i32
    %c0_i32_0 = arith.constant 0 : i32
    %c0_i32_1 = arith.constant 0 : i32
    return %c0_i32, %c0_i32_0 : i32, i32
  }
  func.func @transform_4(%arg0: i32) -> (i32, i32) {
    %c0_i32 = arith.constant 0 : i32
    %c0_i32_0 = arith.constant 0 : i32
    %c0_i32_1 = arith.constant 0 : i32
    return %c0_i32, %c0_i32_0 : i32, i32
  }
  func.func @transform_5(%arg0: i32) -> (i32, i32, i32) {
    %c0_i32 = arith.constant 0 : i32
    %c0_i32_0 = arith.constant 0 : i32
    %c0_i32_1 = arith.constant 0 : i32
    return %arg0, %c0_i32, %c0_i32_0 : i32, i32, i32
  }
}

</mosaic_0001>

<bundles_post_ra>
// kernel: tpu_custom_call.1
= control target key start
LH: loop header
LB: loop body
LE: loop exit
PB: predicated region body
PF: predicated region fallthrough
CT: control target
= control target key end

     0   :  { %s710_s18 = smov 0   ;;  %s799_s0 = inlined_call_operand.vmem [shape: f32[4,32,16], index: 0, kind: input, shape index: {}]   ;;  %s800_s1 = inlined_call_operand.vmem [shape: bf16[32,32], index: 1, kind: input, shape index: {}]   ;;  %s801_s2 = inlined_call_operand.vmem [shape: f32[1,32], index: 2, kind: input, shape index: {}]   ;;  %s802_s3 = inlined_call_operand.vmem [shape: f32[1,32], index: 3, kind: input, shape index: {}]   ;;  %s803_s4 = inlined_call_operand.vmem [shape: f32[1,32], index: 4, kind: input, shape index: {}]   ;;  %s804_s5 = inlined_call_operand.vmem [shape: f32[4,32,16], index: 5, kind: output, shape index: {}]  }
   0x1 LB: > { %s601_s19 = sadd.s32 4294967295, %s678_s18   ;;  %p605_p0 = scmp.ge.s32.totalorder %s678_s18, 1  ;;  %s678_s18 = sphi %s710_s18, %s15_s18  }
   0x2   : > { %p189_p1 = scmp.lt.s32.totalorder %s678_s18, 3 }
   0x4   : > { %p190_p2 = pnand %p605_p0, %p189_p1 }
   0x5   : > { %s606_s20 = sshll.u32 (!%p190_p2), %s601_s19, 1 }
   0x6   : > { %193 = sbr.rel (%p190_p2) target bundleno = 803 (0x323), region = 40  ;;  %p220_p3 = scmp.lt.s32.totalorder (!%p190_p2), %s606_s20, 3 }
   0xb   : > { %s806_s20 = smov (!%p220_p3, %s606_s20), 3  ;;  %v662_v0 = vld [vmem:[%s800_s1 + $0x8] sm:$0xff]   ;;  %v663_v7 = vld [vmem:[%s800_s1] sm:$0xff]   ;;  %vm331_vm0 = vcmask 261120   ;;  %vm534_vm1 = vcmask 130048  }
   0xc   : > { %s621_s21 = sshll.u32 %s806_s20, 5  ;;  %627 = vmatprep.subr.bf16.mxu0 %v662_v0  ;;  %v612_v22 = vld [vmem:[%s801_s2] ss:$0 sm:$0xff] }
   0xd   : > { %s224_s24 = scalar_lea.vmem %s799_s0, %s621_s21  ;;  %628 = vmatpush3.bf16.msra.mxu0 %v662_v0  ;;  %s231_s12 = scalar_lea.vmem %s804_s5, %s621_s21 }
   0xe   : > { %v729_v1 = vld [vmem:[%s224_s24] sm:$0xff]  ;;  %v733_v3 = vld [vmem:[%s224_s24 + $0x8] sm:$0xff]  ;;  %v744_v8 = vld [vmem:[%s224_s24 + $0x10] sm:$0xff]  ;;  %629 = vmatprep.subr.bf16.mxu0 %v663_v7 }
   0xf   : > { %v731_v2 = vld [vmem:[%s224_s24 + $0x20] sm:$0xff]  ;;  %v737_v5 = vld [vmem:[%s224_s24 + $0x28] sm:$0xff]  ;;  %v746_v9 = vld [vmem:[%s224_s24 + $0x30] sm:$0xff] }
  0x10   : > { %v644_v4 = vpack.i.bf16 %v731_v2, %v729_v1  ;;  %v646_v6 = vpack.i.bf16 %v737_v5, %v733_v3  ;;  %v648_v10 = vpack.i.bf16 %v746_v9, %v744_v8  ;;  %v750_v11 = vld [vmem:[%s224_s24 + $0x18] sm:$0xff] }
  0x11   : > { %630 = vmatpush3.bf16.msra.mxu0 %v663_v7  ;;  %v752_v12 = vld [vmem:[%s224_s24 + $0x38] sm:$0xff] }
  0x12   : > { %645 = vxpose.xlu0.b32.start [1/4] (short) (narrow) %v644_v4, 16  ;;  %v650_v13 = vpack.i.bf16 %v752_v12, %v750_v11 }
  0x16   : > { %647 = vxpose.xlu0.b32.cont [2/4] (short) (narrow) %v646_v6, 16 }
  0x1a   : > { %649 = vxpose.xlu0.b32.cont [3/4] (short) (narrow) %v648_v10, 16  ;;  %v617_v10 = vld [vmem:[%s802_s3] ss:$0 sm:$0xff] }
  0x1e   : > { %651 = vxpose.xlu0.b32.end [4/4] (short) (narrow) %v650_v13, 16 }
  0x8e   : > { %v652_v14 = vpop.trf.xlu0 }
  0x8f   : > { %v656_v15 = vunpack.i.h.bf16 %v652_v14  ;;  %v653_v17 = vunpack.i.l.bf16 %v652_v14  ;;  %v618_v14 = vld [vmem:[%s803_s4] ss:$0 sm:$0xff] }
  0x92   : > { %v657_v16 = vpop.trf.xlu0 }
  0x93   : > { %v661_v18 = vunpack.i.h.bf16 %v657_v16  ;;  %v658_v19 = vunpack.i.l.bf16 %v657_v16 }
  0x95   : > { %v306_v20 = vpack.c.bf16 %v658_v19, %v653_v17  ;;  %v307_v21 = vpack.c.bf16 %v661_v18, %v656_v15 }
  0x97   : > { %631 = vmatprep.mubr.msk.bf16.mxu0 %vm331_vm0, %v306_v20 }
  0x98   : > { %632 = vmatmul.mubr.msk.bf16.vlgmr.msra.gmra.mxu0 %vm331_vm0, %v307_v21 }
 0x158   : > { %v633_v23 = vpop.f32.mrf.mxu0 }
 0x159   : > { %v381_v24 = vadd.f32 %v633_v23, %v612_v22 }
 0x15a   : > { %v372_v25 = vpop.f32.mrf.mxu0 }
 0x15b   : > { %v373_v26 = vadd.f32 %v612_v22, %v372_v25  ;;  %v393_v27 = vsel %vm331_vm0, %v381_v24, 0.0 }
 0x15c   : > { %394 = vadd.xlane.f32.xlu1 %v393_v27  ;;  %v634_v28 = vpop.f32.mrf.mxu0 }
 0x15d   : > { %v387_v31 = vsel %vm331_vm0, %v373_v26, 0.0  ;;  %v384_v32 = vadd.f32 %v634_v28, %v612_v22 }
 0x15e   : > { %v375_v29 = vpop.f32.mrf.mxu0 }
 0x15f   : > { %v376_v30 = vadd.f32 %v612_v22, %v375_v29  ;;  %v396_v34 = vsel %vm331_vm0, %v384_v32, 0.0 }
 0x160   : > { %388 = vadd.xlane.f32.xlu1 %v387_v31 }
 0x161   : > { %v390_v33 = vsel %vm331_vm0, %v376_v30, 0.0 }
 0x164   : > { %391 = vadd.xlane.f32.xlu1 %v390_v33 }
 0x168   : > { %397 = vadd.xlane.f32.xlu1 %v396_v34 }
 0x1e5   : > { %v395_v35 = vpop.xlane.xlu1 %394 }
 0x1e6   : > { %v402_v36 = vmul.f32 0.03125, %v395_v35 }
 0x1e8   : > { %v406_v37 = vsub.f32 %v381_v24, %v402_v36 }
 0x1e9   : > { %v389_v38 = vpop.xlane.xlu1 %388 }
 0x1ea   : > { %v400_v39 = vmul.f32 0.03125, %v389_v38  ;;  %v410_v40 = vmul.f32 %v406_v37, %v406_v37 }
 0x1ec   : > { %v404_v41 = vsub.f32 %v373_v26, %v400_v39  ;;  %v418_v42 = vsel %vm331_vm0, %v410_v40, 0.0 }
 0x1ed   : > { %419 = vadd.xlane.f32.xlu1 %v418_v42  ;;  %v392_v43 = vpop.xlane.xlu1 %391 }
 0x1ee   : > { %v401_v44 = vmul.f32 0.03125, %v392_v43  ;;  %v408_v45 = vmul.f32 %v404_v41, %v404_v41 }
 0x1f0   : > { %v405_v46 = vsub.f32 %v376_v30, %v401_v44  ;;  %v412_v47 = vsel %vm331_vm0, %v408_v45, 0.0 }
 0x1f1   : > { %413 = vadd.xlane.f32.xlu0 %v412_v47  ;;  %v398_v48 = vpop.xlane.xlu1 %397 }
 0x1f2   : > { %v403_v49 = vmul.f32 0.03125, %v398_v48  ;;  %v409_v50 = vmul.f32 %v405_v46, %v405_v46 }
 0x1f4   : > { %v407_v51 = vsub.f32 %v384_v32, %v403_v49  ;;  %v415_v52 = vsel %vm331_vm0, %v409_v50, 0.0 }
 0x1f5   : > { %416 = vadd.xlane.f32.xlu1 %v415_v52 }
 0x1f6   : > { %v411_v53 = vmul.f32 %v407_v51, %v407_v51 }
 0x1f8   : > { %v421_v54 = vsel %vm331_vm0, %v411_v53, 0.0 }
 0x1f9   : > { %422 = vadd.xlane.f32.xlu1 %v421_v54 }
 0x276   : > { %v420_v55 = vpop.xlane.xlu1 %419 }
 0x277   : > { %v426_v56 = vmul.f32 0.03125, %v420_v55 }
 0x279   : > { %v430_v57 = vadd.f32 1e-05, %v426_v56 }
 0x27a   : > { %v414_v58 = vpop.xlane.xlu0 %413 }
 0x27b   : > { %664 = vrsqrt.f32 %v430_v57  ;;  %v424_v59 = vmul.f32 0.03125, %v414_v58 }
 0x27d   : > { %v428_v60 = vadd.f32 1e-05, %v424_v59 }
 0x27e   : > { %v417_v61 = vpop.xlane.xlu1 %416 }
 0x27f   : > { %666 = vrsqrt.f32 %v428_v60  ;;  %v425_v62 = vmul.f32 0.03125, %v417_v61 }
 0x281   : > { %v429_v63 = vadd.f32 1e-05, %v425_v62 }
 0x282   : > { %v423_v0 = vpop.xlane.xlu1 %422 }
 0x283   : > { %668 = vrsqrt.f32 %v429_v63  ;;  %v427_v4 = vmul.f32 0.03125, %v423_v0 }
 0x285   : > { %v431_v6 = vadd.f32 1e-05, %v427_v4 }
 0x287   : > { %670 = vrsqrt.f32 %v431_v6 }
 0x288   : > { %v665_v7 = vpop.eup %664 }
 0x289   : > { %v438_v13 = vmul.f32 %v665_v7, %v406_v37 }
 0x28b   : > { %v449_v15 = vmul.f32 %v617_v10, %v438_v13 }
 0x28c   : > { %v667_v16 = vpop.eup %666 }
 0x28d   : > { %v460_v17 = vadd.f32 %v618_v14, %v449_v15  ;;  %v436_v18 = vmul.f32 %v667_v16, %v404_v41 }
 0x28f   : > { %494 = vxpose.xlu0.b32.start [1/2] (short) (narrow) %v460_v17, 32  ;;  %v447_v19 = vmul.f32 %v617_v10, %v436_v18 }
 0x290   : > { %v669_v20 = vpop.eup %668 }
 0x291   : > { %v458_v21 = vadd.f32 %v618_v14, %v447_v19  ;;  %v437_v22 = vmul.f32 %v669_v20, %v405_v46 }
 0x293   : > { %462 = vxpose.xlu1.b32.start [1/2] (short) (narrow) %v458_v21, 32  ;;  %v448_v23 = vmul.f32 %v617_v10, %v437_v22 }
 0x294   : > { %v671_v24 = vpop.eup %670 }
 0x295   : > { %v459_v25 = vadd.f32 %v618_v14, %v448_v23  ;;  %v439_v26 = vmul.f32 %v671_v24, %v407_v51 }
 0x297   : > { %463 = vxpose.xlu1.b32.end [2/2] (short) (narrow) %v459_v25, 32  ;;  %v450_v27 = vmul.f32 %v617_v10, %v439_v26 }
 0x299   : > { %v461_v28 = vadd.f32 %v618_v14, %v450_v27 }
 0x29b   : > { %495 = vxpose.xlu0.b32.end [2/2] (short) (narrow) %v461_v28, 32 }
 0x30f   : > { %v478_v29 = vpop.trf.xlu1 }
 0x310   : > { %v526_v30 = vadd.f32 %v478_v29, %v729_v1 }
 0x312   : > { %535 = vst.msk [vmem:[%s231_s12] sm:$0xff] %vm534_vm1, %v526_v30 }
 0x313   : > { %v510_v31 = vpop.trf.xlu0  ;;  %v479_v32 = vpop.trf.xlu1 }
 0x314   : > { %v530_v33 = vadd.f32 %v510_v31, %v731_v2  ;;  %v527_v34 = vadd.f32 %v479_v32, %v733_v3 }
 0x316   : > { %539 = vst.msk [vmem:[%s231_s12 + $0x20] sm:$0xff] %vm534_vm1, %v530_v33  ;;  %536 = vst.msk [vmem:[%s231_s12 + $0x8] sm:$0xff] %vm534_vm1, %v527_v34 }
 0x317   : > { %v511_v35 = vpop.trf.xlu0  ;;  %v480_v36 = vpop.trf.xlu1 }
 0x318   : > { %v531_v37 = vadd.f32 %v511_v35, %v737_v5  ;;  %v528_v38 = vadd.f32 %v480_v36, %v744_v8 }
 0x31a   : > { %540 = vst.msk [vmem:[%s231_s12 + $0x28] sm:$0xff] %vm534_vm1, %v531_v37  ;;  %537 = vst.msk [vmem:[%s231_s12 + $0x10] sm:$0xff] %vm534_vm1, %v528_v38 }
 0x31b   : > { %v512_v1 = vpop.trf.xlu0  ;;  %v481_v39 = vpop.trf.xlu1 }
 0x31c   : > { %v532_v2 = vadd.f32 %v512_v1, %v746_v9  ;;  %v529_v3 = vadd.f32 %v481_v39, %v750_v11 }
 0x31e   : > { %541 = vst.msk [vmem:[%s231_s12 + $0x30] sm:$0xff] %vm534_vm1, %v532_v2  ;;  %538 = vst.msk [vmem:[%s231_s12 + $0x18] sm:$0xff] %vm534_vm1, %v529_v3 }
 0x31f   : > { %v513_v40 = vpop.trf.xlu0 }
 0x320   : > { %v533_v41 = vadd.f32 %v513_v40, %v752_v12 }
 0x322   : > { %542 = vst.msk [vmem:[%s231_s12 + $0x38] sm:$0xff] %vm534_vm1, %v533_v41 }
 0x323 PF: > { %s15_s18 = sadd.s32 1, %s678_s18  }
 0x324   : > { %p12_p4 = scmp.ge.s32.totalorder %s15_s18, 4  }
 0x326   :  { %14 = sbr.rel (!%p12_p4) target bundleno = 1 (0x1), region = 70 }

</bundles_post_ra>
